<compile_context>
chip_gen: v7x
topology: tpu7x:2x2x1
jax: 0.10.0
libtpu: 0.0.40
codegen_flags: <defaults>
</compile_context>

<pallas_src>
import functools

import jax
import jax.numpy as jnp
from jax.experimental import pallas as pl
from jax.experimental.pallas import tpu as pltpu


def _round_up(n: int, m: int) -> int:
    return ((n + m - 1) // m) * m


def _cdiv(a: int, b: int) -> int:
    return (a + b - 1) // b


def _clipped_mlp_kernel(x_ref, w1_ref, b1_ref, w2_ref, b2_ref, o_ref, *, clip):
    # Linear 1 (MXU, f32 accumulation) + bias + ReLU (VPU).
    h = jnp.dot(x_ref[...], w1_ref[...], preferred_element_type=jnp.float32)
    h = jnp.maximum(h + b1_ref[...], 0.0)            # (1, pk_h) bias broadcasts over rows
    # Linear 2 (MXU, f32 accumulation) + bias. Activations cast to the weight dtype
    # (bf16 fast path); accumulation stays f32.
    y = jnp.dot(h.astype(w2_ref.dtype), w2_ref[...],
                preferred_element_type=jnp.float32)
    y = y + b2_ref[...]
    # ClippedModule: torch.clip(y, -clip, clip).
    o_ref[...] = jnp.clip(y, -clip, clip).astype(o_ref.dtype)


def clipped_mlp(x, w1, b1, w2, b2, clip, *, tile_rows=8192,
                compute_dtype=jnp.bfloat16, out_dtype=None):
    """Fused (Linear -> ReLU -> Linear -> clip) forward.

    x: (B, d_in); w1: (d_in, H); b1: (1, H) or (H,); w2: (H, d_out); b2: (1, d_out) or (d_out,).
    compute_dtype: dtype for x / W1 / W2 inside the kernel (f32 MXU accumulation kept).
    out_dtype: output dtype (defaults to x.dtype, i.e. f32 contract preserved).
    """
    out_dtype = jnp.dtype(out_dtype) if out_dtype is not None else jnp.dtype(x.dtype)
    compute_dtype = (jnp.dtype(compute_dtype) if compute_dtype is not None
                     else jnp.dtype(x.dtype))

    B, d_in = x.shape
    H = w1.shape[1]
    d_out = w2.shape[1]

    # --- Batch-in-lanes packing factor (lane-dense x / out, bigger MXU tiles). ---
    pack = 128 // d_in if (d_in < 128 and 128 % d_in == 0) else 1

    # Block-diagonal packed weights / lane-tiled biases (tiny, built once).
    eye = jnp.eye(pack, dtype=jnp.float32)
    w1_blk = jnp.kron(eye, w1.astype(jnp.float32)).astype(compute_dtype)
    w2_blk = jnp.kron(eye, w2.astype(jnp.float32)).astype(compute_dtype)
    b1_blk = jnp.tile(b1.reshape(1, -1).astype(jnp.float32), (1, pack))
    b2_blk = jnp.tile(b2.reshape(1, -1).astype(jnp.float32), (1, pack))

    pk_in, pk_h, pk_out = pack * d_in, pack * H, pack * d_out

    x_c = x.astype(compute_dtype)

    # --- Batch tiling (in packed rows). ---
    sublane = 16 if compute_dtype == jnp.dtype(jnp.bfloat16) else 8
    packed_rows = _cdiv(B, pack)
    tile_bp = max(sublane, min(max(1, tile_rows // pack),
                               _round_up(packed_rows, sublane)))
    tile_bp = _round_up(tile_bp, sublane)
    # Keep >= ~16 grid steps when the batch allows it (v7x megacore + pipeline overlap).
    tile_bp = min(tile_bp, max(sublane, _round_up(_cdiv(packed_rows, 16), sublane)))

    packed_rows_pad = _round_up(packed_rows, tile_bp)
    B_pad = packed_rows_pad * pack
    if B_pad != B:
        x_c = jnp.pad(x_c, ((0, B_pad - B), (0, 0)))
    x_p = x_c.reshape(packed_rows_pad, pk_in)        # free contiguous reshape
    grid = (packed_rows_pad // tile_bp,)

    itemsize_in = jnp.dtype(compute_dtype).itemsize
    itemsize_out = jnp.dtype(out_dtype).itemsize
    cost = pl.CostEstimate(
        flops=2 * packed_rows_pad * pk_in * pk_h + 2 * packed_rows_pad * pk_h * pk_out,
        transcendentals=0,
        bytes_accessed=(packed_rows_pad * pk_in * itemsize_in
                        + (w1_blk.size + w2_blk.size) * itemsize_in
                        + (b1_blk.size + b2_blk.size) * 4
                        + packed_rows_pad * pk_out * itemsize_out),
    )

    # Explicit VMEM budget only when double-buffered tiles would exceed the 16 MiB
    # scoped default (v5e); otherwise leave the compiler default alone.
    weight_bytes = ((w1_blk.size + w2_blk.size) * itemsize_in
                    + (b1_blk.size + b2_blk.size) * 4)
    tile_bytes = tile_bp * (pk_in * itemsize_in + pk_out * itemsize_out)
    need_bytes = 2 * tile_bytes + 2 * weight_bytes + (2 << 20)
    vmem_kwargs = {}
    if need_bytes > (16 << 20):
        vmem_kwargs = dict(vmem_limit_bytes=min(need_bytes, 100 << 20))

    kernel = functools.partial(_clipped_mlp_kernel, clip=float(clip))

    def _call(single_buffer_weights):
        res_kwargs = ({"pipeline_mode": pl.Buffered(1)}
                      if single_buffer_weights else {})
        return pl.pallas_call(
            kernel,
            out_shape=jax.ShapeDtypeStruct((packed_rows_pad, pk_out), out_dtype),
            grid_spec=pltpu.PrefetchScalarGridSpec(
                num_scalar_prefetch=0,
                grid=grid,
                in_specs=[
                    # x streams through in packed-batch tiles (auto double-buffered).
                    pl.BlockSpec((tile_bp, pk_in), lambda i: (i, 0)),
                    # Weights / biases: constant block index -> fetched once, VMEM-resident.
                    pl.BlockSpec(w1_blk.shape, lambda i: (0, 0), **res_kwargs),
                    pl.BlockSpec(b1_blk.shape, lambda i: (0, 0), **res_kwargs),
                    pl.BlockSpec(w2_blk.shape, lambda i: (0, 0), **res_kwargs),
                    pl.BlockSpec(b2_blk.shape, lambda i: (0, 0), **res_kwargs),
                ],
                out_specs=pl.BlockSpec((tile_bp, pk_out), lambda i: (i, 0)),
            ),
            compiler_params=pltpu.CompilerParams(
                dimension_semantics=("parallel",), **vmem_kwargs),
            cost_estimate=cost,
        )(x_p, w1_blk, b1_blk, w2_blk, b2_blk)

    try:
        out_p = jax.block_until_ready(_call(True))
    except Exception:
        # pipeline_mode / Buffered(1) unsupported in this JAX -> default buffering.
        out_p = jax.block_until_ready(_call(False))

    out = out_p.reshape(B_pad, d_out)
    if B_pad != B:
        out = out[:B]
    return out


def _reference(x, w1, b1, w2, b2, clip):
    h = jnp.maximum(x @ w1 + b1, 0.0)
    y = h @ w2 + b2
    return jnp.clip(y, -clip, clip)


if __name__ == "__main__":
    # Small shapes consistent with the wrapped MLP: batch=8, d_in=32, hidden=64, d_out=32.
    B, D_IN, HIDDEN, D_OUT = 8, 32, 64, 32
    CLIP = 0.5

    key = jax.random.PRNGKey(0)
    kx, k1, kb1, k2, kb2 = jax.random.split(key, 5)

    x = jax.random.normal(kx, (B, D_IN), dtype=jnp.float32)
    # Deterministic synthetic parameter init (uniform, roughly PyTorch-Linear scale).
    lim1 = 1.0 / (D_IN ** 0.5)
    lim2 = 1.0 / (HIDDEN ** 0.5)
    w1 = jax.random.uniform(k1, (D_IN, HIDDEN), jnp.float32, -lim1, lim1)
    b1 = jax.random.uniform(kb1, (1, HIDDEN), jnp.float32, -lim1, lim1)
    w2 = jax.random.uniform(k2, (HIDDEN, D_OUT), jnp.float32, -lim2, lim2)
    b2 = jax.random.uniform(kb2, (1, D_OUT), jnp.float32, -lim2, lim2)

    ref = _reference(x, w1, b1, w2, b2, CLIP)

    # Exact f32 path (block-diagonal packing adds only exact zero accumulations).
    out_f32 = jax.block_until_ready(
        clipped_mlp(x, w1, b1, w2, b2, CLIP, compute_dtype=jnp.float32))
    assert out_f32.shape == (B, D_OUT) and out_f32.dtype == jnp.float32
    assert jnp.allclose(out_f32, ref, atol=2e-5, rtol=2e-5)
    assert float(jnp.max(jnp.abs(out_f32))) <= CLIP + 1e-6

    # Default fast path: bf16 x / weights (f32 accumulation, f32 biases/clip), f32 out.
    out = jax.block_until_ready(clipped_mlp(x, w1, b1, w2, b2, CLIP))
    assert out.shape == (B, D_OUT) and out.dtype == jnp.float32
    assert jnp.allclose(out, ref, atol=3e-2, rtol=3e-2)
    assert float(jnp.max(jnp.abs(out))) <= CLIP + 1e-6

    # bf16 output option (halves the dominant output stream; clip bound keeps it benign).
    out_bf16 = jax.block_until_ready(
        clipped_mlp(x, w1, b1, w2, b2, CLIP, out_dtype=jnp.bfloat16))
    assert out_bf16.shape == (B, D_OUT) and out_bf16.dtype == jnp.bfloat16
    assert jnp.allclose(out_bf16.astype(jnp.float32), ref, atol=3e-2, rtol=3e-2)
    assert float(jnp.max(jnp.abs(out_bf16.astype(jnp.float32)))) <= CLIP + 1e-6

    print("KERNEL_OK")
</pallas_src>

<mosaic_0001>
module attributes {stable_mosaic.version = 11 : i64} {
  func.func @_clipped_mlp_kernel(%arg0: i32, %arg1: memref<8x128xf32, #tpu.memory_space<vmem>>, %arg2: memref<128x256xf32, #tpu.memory_space<vmem>>, %arg3: memref<1x256xf32, #tpu.memory_space<vmem>>, %arg4: memref<256x128xf32, #tpu.memory_space<vmem>>, %arg5: memref<1x128xf32, #tpu.memory_space<vmem>>, %arg6: memref<8x128xf32, #tpu.memory_space<vmem>>) attributes {dimension_semantics = [#tpu.dimension_semantics<parallel>], iteration_bounds = array<i64: 1>, scalar_prefetch = 0 : i64, scratch_operands = 0 : i64, tpu.core_type = #tpu.core_type<tc>, window_params = [{transform_indices = @transform_0, window_bounds = array<i64: 8, 128>}, {pipeline_mode = #tpu.pipeline_mode<synchronous>, transform_indices = @transform_1, window_bounds = array<i64: 128, 256>}, {pipeline_mode = #tpu.pipeline_mode<synchronous>, transform_indices = @transform_2, window_bounds = array<i64: 1, 256>}, {pipeline_mode = #tpu.pipeline_mode<synchronous>, transform_indices = @transform_3, window_bounds = array<i64: 256, 128>}, {pipeline_mode = #tpu.pipeline_mode<synchronous>, transform_indices = @transform_4, window_bounds = array<i64: 1, 128>}, {transform_indices = @transform_5, window_bounds = array<i64: 8, 128>}]} {
    %c0 = arith.constant 0 : index
    %c0_0 = arith.constant 0 : index
    %0 = vector.load %arg1[%c0, %c0_0] : memref<8x128xf32, #tpu.memory_space<vmem>>, vector<8x128xf32>
    %c0_1 = arith.constant 0 : index
    %c0_2 = arith.constant 0 : index
    %1 = vector.load %arg2[%c0_1, %c0_2] : memref<128x256xf32, #tpu.memory_space<vmem>>, vector<128x256xf32>
    %cst = arith.constant dense<0.000000e+00> : vector<8x256xf32>
    %2 = tpu.matmul %0, %1, %cst {dimension_numbers = #tpu.dot_dimension_numbers<[1], [0], [0], [1], [0, 0, 1, 1], [], []>} : vector<8x128xf32>, vector<128x256xf32>, vector<8x256xf32> -> vector<8x256xf32>
    %c0_3 = arith.constant 0 : index
    %c0_4 = arith.constant 0 : index
    %3 = vector.load %arg3[%c0_3, %c0_4] : memref<1x256xf32, #tpu.memory_space<vmem>>, vector<1x256xf32>
    %4 = vector.broadcast %3 : vector<1x256xf32> to vector<8x256xf32>
    %5 = arith.addf %2, %4 : vector<8x256xf32>
    %cst_5 = arith.constant 0.000000e+00 : f32
    %6 = vector.broadcast %cst_5 : f32 to vector<8x256xf32>
    %7 = arith.maximumf %5, %6 : vector<8x256xf32>
    %c0_6 = arith.constant 0 : index
    %c0_7 = arith.constant 0 : index
    %8 = vector.load %arg4[%c0_6, %c0_7] : memref<256x128xf32, #tpu.memory_space<vmem>>, vector<256x128xf32>
    %cst_8 = arith.constant dense<0.000000e+00> : vector<8x128xf32>
    %9 = tpu.matmul %7, %8, %cst_8 {dimension_numbers = #tpu.dot_dimension_numbers<[1], [0], [0], [1], [0, 0, 1, 1], [], []>} : vector<8x256xf32>, vector<256x128xf32>, vector<8x128xf32> -> vector<8x128xf32>
    %c0_9 = arith.constant 0 : index
    %c0_10 = arith.constant 0 : index
    %10 = vector.load %arg5[%c0_9, %c0_10] : memref<1x128xf32, #tpu.memory_space<vmem>>, vector<1x128xf32>
    %11 = vector.broadcast %10 : vector<1x128xf32> to vector<8x128xf32>
    %12 = arith.addf %9, %11 : vector<8x128xf32>
    %cst_11 = arith.constant -5.000000e-01 : f32
    %cst_12 = arith.constant 5.000000e-01 : f32
    %13 = vector.broadcast %cst_11 : f32 to vector<8x128xf32>
    %14 = arith.maximumf %13, %12 : vector<8x128xf32>
    %15 = vector.broadcast %cst_12 : f32 to vector<8x128xf32>
    %16 = arith.minimumf %15, %14 : vector<8x128xf32>
    %c0_13 = arith.constant 0 : index
    %c0_14 = arith.constant 0 : index
    %17 = vector.load %arg6[%c0_13, %c0_14] : memref<8x128xf32, #tpu.memory_space<vmem>>, vector<8x128xf32>
    tpu.vector_store %arg6[%c0_13, %c0_14], %16 {strides = array<i32>} : memref<8x128xf32, #tpu.memory_space<vmem>>, vector<8x128xf32>,
    return
  }
  func.func @transform_0(%arg0: i32) -> (i32, i32) {
    %c0_i32 = arith.constant 0 : i32
    %c0_i32_0 = arith.constant 0 : i32
    return %arg0, %c0_i32 : i32, i32
  }
  func.func @transform_1(%arg0: i32) -> (i32, i32) {
    %c0_i32 = arith.constant 0 : i32
    %c0_i32_0 = arith.constant 0 : i32
    %c0_i32_1 = arith.constant 0 : i32
    return %c0_i32, %c0_i32_0 : i32, i32
  }
  func.func @transform_2(%arg0: i32) -> (i32, i32) {
    %c0_i32 = arith.constant 0 : i32
    %c0_i32_0 = arith.constant 0 : i32
    %c0_i32_1 = arith.constant 0 : i32
    return %c0_i32, %c0_i32_0 : i32, i32
  }
  func.func @transform_3(%arg0: i32) -> (i32, i32) {
    %c0_i32 = arith.constant 0 : i32
    %c0_i32_0 = arith.constant 0 : i32
    %c0_i32_1 = arith.constant 0 : i32
    return %c0_i32, %c0_i32_0 : i32, i32
  }
  func.func @transform_4(%arg0: i32) -> (i32, i32) {
    %c0_i32 = arith.constant 0 : i32
    %c0_i32_0 = arith.constant 0 : i32
    %c0_i32_1 = arith.constant 0 : i32
    return %c0_i32, %c0_i32_0 : i32, i32
  }
  func.func @transform_5(%arg0: i32) -> (i32, i32) {
    %c0_i32 = arith.constant 0 : i32
    %c0_i32_0 = arith.constant 0 : i32
    return %arg0, %c0_i32 : i32, i32
  }
}

module attributes {stable_mosaic.version = 11 : i64} {
  func.func @_clipped_mlp_kernel(%arg0: i32, %arg1: memref<8x128xf32, #tpu.memory_space<vmem>>, %arg2: memref<128x256xf32, #tpu.memory_space<vmem>>, %arg3: memref<1x256xf32, #tpu.memory_space<vmem>>, %arg4: memref<256x128xf32, #tpu.memory_space<vmem>>, %arg5: memref<1x128xf32, #tpu.memory_space<vmem>>, %arg6: memref<8x128xf32, #tpu.memory_space<vmem>>) attributes {dimension_semantics = [#tpu.dimension_semantics<parallel>], iteration_bounds = array<i64: 1>, scalar_prefetch = 0 : i64, scratch_operands = 0 : i64, tpu.core_type = #tpu.core_type<tc>, window_params = [{transform_indices = @transform_0, window_bounds = array<i64: 8, 128>}, {pipeline_mode = #tpu.pipeline_mode<synchronous>, transform_indices = @transform_1, window_bounds = array<i64: 128, 256>}, {pipeline_mode = #tpu.pipeline_mode<synchronous>, transform_indices = @transform_2, window_bounds = array<i64: 1, 256>}, {pipeline_mode = #tpu.pipeline_mode<synchronous>, transform_indices = @transform_3, window_bounds = array<i64: 256, 128>}, {pipeline_mode = #tpu.pipeline_mode<synchronous>, transform_indices = @transform_4, window_bounds = array<i64: 1, 128>}, {transform_indices = @transform_5, window_bounds = array<i64: 8, 128>}]} {
    %c0 = arith.constant 0 : index
    %c0_0 = arith.constant 0 : index
    %0 = vector.load %arg1[%c0, %c0_0] : memref<8x128xf32, #tpu.memory_space<vmem>>, vector<8x128xf32>
    %c0_1 = arith.constant 0 : index
    %c0_2 = arith.constant 0 : index
    %1 = vector.load %arg2[%c0_1, %c0_2] : memref<128x256xf32, #tpu.memory_space<vmem>>, vector<128x256xf32>
    %cst = arith.constant dense<0.000000e+00> : vector<8x256xf32>
    %2 = tpu.matmul %0, %1, %cst {dimension_numbers = #tpu.dot_dimension_numbers<[1], [0], [0], [1], [0, 0, 1, 1], [], []>} : vector<8x128xf32>, vector<128x256xf32>, vector<8x256xf32> -> vector<8x256xf32>
    %c0_3 = arith.constant 0 : index
    %c0_4 = arith.constant 0 : index
    %3 = vector.load %arg3[%c0_3, %c0_4] : memref<1x256xf32, #tpu.memory_space<vmem>>, vector<1x256xf32>
    %4 = vector.broadcast %3 : vector<1x256xf32> to vector<8x256xf32>
    %5 = arith.addf %2, %4 : vector<8x256xf32>
    %cst_5 = arith.constant 0.000000e+00 : f32
    %6 = vector.broadcast %cst_5 : f32 to vector<8x256xf32>
    %7 = arith.maximumf %5, %6 : vector<8x256xf32>
    %c0_6 = arith.constant 0 : index
    %c0_7 = arith.constant 0 : index
    %8 = vector.load %arg4[%c0_6, %c0_7] : memref<256x128xf32, #tpu.memory_space<vmem>>, vector<256x128xf32>
    %cst_8 = arith.constant dense<0.000000e+00> : vector<8x128xf32>
    %9 = tpu.matmul %7, %8, %cst_8 {dimension_numbers = #tpu.dot_dimension_numbers<[1], [0], [0], [1], [0, 0, 1, 1], [], []>} : vector<8x256xf32>, vector<256x128xf32>, vector<8x128xf32> -> vector<8x128xf32>
    %c0_9 = arith.constant 0 : index
    %c0_10 = arith.constant 0 : index
    %10 = vector.load %arg5[%c0_9, %c0_10] : memref<1x128xf32, #tpu.memory_space<vmem>>, vector<1x128xf32>
    %11 = vector.broadcast %10 : vector<1x128xf32> to vector<8x128xf32>
    %12 = arith.addf %9, %11 : vector<8x128xf32>
    %cst_11 = arith.constant -5.000000e-01 : f32
    %cst_12 = arith.constant 5.000000e-01 : f32
    %13 = vector.broadcast %cst_11 : f32 to vector<8x128xf32>
    %14 = arith.maximumf %13, %12 : vector<8x128xf32>
    %15 = vector.broadcast %cst_12 : f32 to vector<8x128xf32>
    %16 = arith.minimumf %15, %14 : vector<8x128xf32>
    %c0_13 = arith.constant 0 : index
    %c0_14 = arith.constant 0 : index
    %17 = vector.load %arg6[%c0_13, %c0_14] : memref<8x128xf32, #tpu.memory_space<vmem>>, vector<8x128xf32>
    tpu.vector_store %arg6[%c0_13, %c0_14], %16 {strides = array<i32>} : memref<8x128xf32, #tpu.memory_space<vmem>>, vector<8x128xf32>,
    return
  }
  func.func @transform_0(%arg0: i32) -> (i32, i32) {
    %c0_i32 = arith.constant 0 : i32
    %c0_i32_0 = arith.constant 0 : i32
    return %arg0, %c0_i32 : i32, i32
  }
  func.func @transform_1(%arg0: i32) -> (i32, i32) {
    %c0_i32 = arith.constant 0 : i32
    %c0_i32_0 = arith.constant 0 : i32
    %c0_i32_1 = arith.constant 0 : i32
    return %c0_i32, %c0_i32_0 : i32, i32
  }
  func.func @transform_2(%arg0: i32) -> (i32, i32) {
    %c0_i32 = arith.constant 0 : i32
    %c0_i32_0 = arith.constant 0 : i32
    %c0_i32_1 = arith.constant 0 : i32
    return %c0_i32, %c0_i32_0 : i32, i32
  }
  func.func @transform_3(%arg0: i32) -> (i32, i32) {
    %c0_i32 = arith.constant 0 : i32
    %c0_i32_0 = arith.constant 0 : i32
    %c0_i32_1 = arith.constant 0 : i32
    return %c0_i32, %c0_i32_0 : i32, i32
  }
  func.func @transform_4(%arg0: i32) -> (i32, i32) {
    %c0_i32 = arith.constant 0 : i32
    %c0_i32_0 = arith.constant 0 : i32
    %c0_i32_1 = arith.constant 0 : i32
    return %c0_i32, %c0_i32_0 : i32, i32
  }
  func.func @transform_5(%arg0: i32) -> (i32, i32) {
    %c0_i32 = arith.constant 0 : i32
    %c0_i32_0 = arith.constant 0 : i32
    return %arg0, %c0_i32 : i32, i32
  }
}

</mosaic_0001>

<bundles_post_ra>
// kernel: tpu_custom_call.1
= control target key start
LH: loop header
LB: loop body
LE: loop exit
PB: predicated region body
PF: predicated region fallthrough
CT: control target
= control target key end

     0   :  { %10 = vsyncpa [#allocation3], 0  ;;  %s603_s0 = inlined_call_operand.hbm [shape: f32[8,128], index: 0, kind: input, shape index: {}]   ;;  %s604_s1 = inlined_call_operand.hbm [shape: f32[128,256], index: 1, kind: input, shape index: {}]   ;;  %s605_s2 = inlined_call_operand.vmem [shape: f32[1,256], index: 2, kind: input, shape index: {}]   ;;  %s606_s3 = inlined_call_operand.hbm [shape: f32[256,128], index: 3, kind: input, shape index: {}]   ;;  %s607_s4 = inlined_call_operand.vmem [shape: f32[1,128], index: 4, kind: input, shape index: {}]   ;;  %s608_s5 = inlined_call_operand.hbm [shape: f32[8,128], index: 5, kind: output, shape index: {}]  }
   0x1   :  { %11 = vsyncpa [#allocation6], 0 }
   0x2   :  { %12 = vsyncpa [#allocation4], 0  ;;  %s510_s18 = smov [#allocation5]   ;;  %s416_s22 = scalar_lea.hbm %s604_s1, 4096 }
   0x3   :  { %s28_s19 = sshll.u32 %s510_s18, 4  ;;  %p417_p0 = scmp.ne.s32.totalorder %s604_s1, %s416_s22  ;;  %s29_s19 = int_to_ptr.vmem [resolvable:$true] %s28_s19 }
   0x4   :  { %p420_p1 = scmp.lt.u32.totalorder %s416_s22, %s604_s1 }
   0x6   :  { %p422_p2 = pnand %p420_p1, %p417_p0 }
   0x8   :  { %425 = shalt.err (!%p422_p2)
}
   0x9   :  { %s426_s27 = scalar_lea.vmem %s29_s19, 4096  ;;  %p431_p4 = scmp.lt.s32.totalorder %s29_s19, %s29_s19 }
   0xa   :  { %p427_p3 = scmp.ne.s32.totalorder %s29_s19, %s426_s27  ;;  %p432_p5 = scmp.lt.s32.totalorder %s426_s27, %s426_s27 }
   0xc   :  { %p433_p6 = por %p432_p5, %p431_p4 }
   0xe   :  { %p434_p7 = pnand %p433_p6, %p427_p3 }
  0x10   :  { %437 = shalt.err (!%p434_p7)
}
  0x11   :  { %s511_s28 = smov 256   ;;  %s512_s29 = smov 16  }
  0x12   :  { %34 = dma.hbm_to_vmem [thread:$0]  %s604_s1, 4096, %s29_s19, [#allocation6], %s511_s28, %s511_s28, %s512_s29  }
  0x13   :  { %s513_s7 = smov [#allocation2]   ;;  %s514_s9 = smov [#allocation7]  }
  0x14   :  { %s19_s8 = sshll.u32 %s513_s7, 4  ;;  %s42_s10 = sshll.u32 %s514_s9, 4  ;;  %s20_s8 = int_to_ptr.vmem [resolvable:$true] %s19_s8  ;;  %s43_s10 = int_to_ptr.vmem [resolvable:$true] %s42_s10 }
  0x15   :  { %s438_s13 = scalar_lea.hbm %s603_s0, 128 }
  0x16   :  { %p439_p8 = scmp.ne.s32.totalorder %s603_s0, %s438_s13  ;;  %p442_p9 = scmp.lt.u32.totalorder %s438_s13, %s603_s0 }
  0x18   :  { %p444_p10 = pnand %p442_p9, %p439_p8 }
  0x1a   :  { %447 = shalt.err (!%p444_p10)
}
  0x1b   :  { %s448_s1 = scalar_lea.vmem %s20_s8, 128  ;;  %p453_p12 = scmp.lt.s32.totalorder %s20_s8, %s20_s8 }
  0x1c   :  { %p449_p11 = scmp.ne.s32.totalorder %s20_s8, %s448_s1  ;;  %p454_p13 = scmp.lt.s32.totalorder %s448_s1, %s448_s1 }
  0x1e   :  { %p455_p0 = por %p454_p13, %p453_p12 }
  0x20   :  { %p456_p1 = pnand %p455_p0, %p449_p11 }
  0x22   :  { %459 = shalt.err (!%p456_p1)
}
  0x23   :  { %22 = dma.hbm_to_vmem [thread:$0]  %s603_s0, 128, %s20_s8, [#allocation3]  }
  0x24   :  { %s460_s22 = scalar_lea.hbm %s606_s3, 4096 }
  0x25   :  { %p461_p2 = scmp.ne.s32.totalorder %s606_s3, %s460_s22  ;;  %p464_p3 = scmp.lt.u32.totalorder %s460_s22, %s606_s3 }
  0x27   :  { %p466_p4 = pnand %p464_p3, %p461_p2 }
  0x29   :  { %469 = shalt.err (!%p466_p4)
}
  0x2a   :  { %s470_s27 = scalar_lea.vmem %s43_s10, 4096  ;;  %p475_p6 = scmp.lt.s32.totalorder %s43_s10, %s43_s10 }
  0x2b   :  { %p471_p5 = scmp.ne.s32.totalorder %s43_s10, %s470_s27  ;;  %p476_p7 = scmp.lt.s32.totalorder %s470_s27, %s470_s27 }
  0x2d   :  { %p477_p8 = por %p476_p7, %p475_p6 }
  0x2f   :  { %p478_p9 = pnand %p477_p8, %p471_p5 }
  0x31   :  { %481 = shalt.err (!%p478_p9)
}
  0x32   :  { %s515_s0 = smov 128   ;;  %s516_s28 = smov 8  }
  0x33   :  { %48 = dma.hbm_to_vmem [thread:$0]  %s606_s3, 4096, %s43_s10, [#allocation6], %s515_s0, %s515_s0, %s516_s28  }
  0x34   :  { %504 = dma.done.wait [#allocation3], 128  }
  0x35   :  { %505 = vsyncadd [#allocation3], 4294967168 }
  0x36   :  { %506 = dma.done.wait [#allocation6], 8192  }
  0x37   :  { %507 = vsyncadd [#allocation6], 4294959104  ;;  %v517_v0 = vmov 0.0   ;;  %v62_v1 = vld [vmem:[#allocation5 + $0x8] sm:$0xff]  ;;  %v64_v2 = vld [vmem:[#allocation5 + $0x18] sm:$0xff]  ;;  %s518_s9 = smov [#allocation8]  }
  0x38   :  { %169 = vmatprep.mubr.f32.mxu0 %v517_v0  ;;  %v61_v3 = vld [vmem:[#allocation5] sm:$0xff]  ;;  %v343_v4 = vpack.c.bf16 %v64_v2, %v62_v1  ;;  %v63_v5 = vld [vmem:[#allocation5 + $0x10] sm:$0xff]  ;;  %v66_v6 = vld [vmem:[#allocation5 + $0x28] sm:$0xff] }
  0x39   :  { %v68_v7 = vld [vmem:[#allocation5 + $0x38] sm:$0xff]  ;;  %v345_v8 = vpack.c.bf16 %v63_v5, %v61_v3  ;;  %v65_v10 = vld [vmem:[#allocation5 + $0x20] sm:$0xff]  ;;  %v67_v11 = vld [vmem:[#allocation5 + $0x30] sm:$0xff] }
  0x3a   :  { %v347_v9 = vpack.c.bf16 %v68_v7, %v66_v6  ;;  %v70_v12 = vld [vmem:[#allocation5 + $0x48] sm:$0xff]  ;;  %344 = vmatprep.subr.bf16.mxu0 %v343_v4  ;;  %v72_v13 = vld [vmem:[#allocation5 + $0x58] sm:$0xff]  ;;  %v349_v14 = vpack.c.bf16 %v67_v11, %v65_v10  ;;  %v69_v16 = vld [vmem:[#allocation5 + $0x40] sm:$0xff] }
  0x3b   :  { %346 = vmatpush1.bf16.msra.mxu0 %v345_v8  ;;  %v351_v15 = vpack.c.bf16 %v72_v13, %v70_v12  ;;  %v71_v17 = vld [vmem:[#allocation5 + $0x50] sm:$0xff]  ;;  %v74_v18 = vld [vmem:[#allocation5 + $0x68] sm:$0xff]  ;;  %v76_v19 = vld [vmem:[#allocation5 + $0x78] sm:$0xff] }
  0x3c   :  { %348 = vmatprep.subr.bf16.mxu0 %v347_v9  ;;  %v353_v20 = vpack.c.bf16 %v71_v17, %v69_v16  ;;  %v355_v21 = vpack.c.bf16 %v76_v19, %v74_v18  ;;  %v73_v22 = vld [vmem:[#allocation5 + $0x60] sm:$0xff]  ;;  %v75_v23 = vld [vmem:[#allocation5 + $0x70] sm:$0xff]  ;;  %v78_v24 = vld [vmem:[#allocation5 + $0x88] sm:$0xff] }
  0x3d   :  { %v80_v25 = vld [vmem:[#allocation5 + $0x98] sm:$0xff]  ;;  %v77_v26 = vld [vmem:[#allocation5 + $0x80] sm:$0xff]  ;;  %v79_v27 = vld [vmem:[#allocation5 + $0x90] sm:$0xff]  ;;  %v357_v31 = vpack.c.bf16 %v75_v23, %v73_v22 }
  0x3e   :  { %v194_v28 = vld [vmem:[#allocation7 + $0x80] sm:$0xff]  ;;  %v195_v29 = vld [vmem:[#allocation7 + $0x88] sm:$0xff]  ;;  %v196_v34 = vld [vmem:[#allocation7 + $0x90] sm:$0xff]  ;;  %v359_v36 = vpack.c.bf16 %v80_v25, %v78_v24  ;;  %v361_v46 = vpack.c.bf16 %v79_v27, %v77_v26 }
  0x3f   :  { %350 = vmatpush1.bf16.msra.mxu0 %v349_v14  ;;  %v178_v30 = vld [vmem:[#allocation7] sm:$0xff]  ;;  %v375_v32 = vpack.c.bf16 %v195_v29, %v194_v28  ;;  %v179_v33 = vld [vmem:[#allocation7 + $0x8] sm:$0xff]  ;;  %v197_v35 = vld [vmem:[#allocation7 + $0x98] sm:$0xff] }
  0x40   :  { %352 = vmatprep.subr.bf16.mxu0 %v351_v15  ;;  %v377_v37 = vpack.c.bf16 %v179_v33, %v178_v30  ;;  %v379_v38 = vpack.c.bf16 %v197_v35, %v196_v34  ;;  %v180_v39 = vld [vmem:[#allocation7 + $0x10] sm:$0xff]  ;;  %v181_v40 = vld [vmem:[#allocation7 + $0x18] sm:$0xff]  ;;  %v198_v41 = vld [vmem:[#allocation7 + $0xa0] sm:$0xff]  ;;  %v95_v34 = vlaneseq }
  0x41   :  { %v82_v42 = vld [vmem:[#allocation5 + $0xa8] sm:$0xff]  ;;  %v84_v43 = vld [vmem:[#allocation5 + $0xb8] sm:$0xff]  ;;  %376 = vmatprep.subr.bf16.mxu1 %v375_v32  ;;  %v381_v45 = vpack.c.bf16 %v181_v40, %v180_v39  ;;  %v81_v47 = vld [vmem:[#allocation5 + $0xa0] sm:$0xff] }
  0x42   :  { %v199_v44 = vld [vmem:[#allocation7 + $0xa8] sm:$0xff]  ;;  %378 = vmatpush3.bf16.msra.mxu1 %v377_v37  ;;  %v182_v49 = vld [vmem:[#allocation7 + $0x20] sm:$0xff]  ;;  %v363_v51 = vpack.c.bf16 %v84_v43, %v82_v42  ;;  %v83_v52 = vld [vmem:[#allocation5 + $0xb0] sm:$0xff]  ;;  %v96_v35 = vshrl.u32 %v95_v34, 7 }
  0x43   :  { %354 = vmatpush1.bf16.msra.mxu0 %v353_v20  ;;  %380 = vmatprep.subr.bf16.mxu1 %v379_v38  ;;  %v383_v48 = vpack.c.bf16 %v199_v44, %v198_v41  ;;  %v183_v50 = vld [vmem:[#allocation7 + $0x28] sm:$0xff]  ;;  %v200_v53 = vld [vmem:[#allocation7 + $0xb0] sm:$0xff]  ;;  %v201_v54 = vld [vmem:[#allocation7 + $0xb8] sm:$0xff]  ;;  %v365_v58 = vpack.c.bf16 %v83_v52, %v81_v47 }
  0x44   :  { %356 = vmatprep.subr.bf16.mxu0 %v355_v21  ;;  %v86_v55 = vld [vmem:[#allocation5 + $0xc8] sm:$0xff]  ;;  %v88_v56 = vld [vmem:[#allocation5 + $0xd8] sm:$0xff]  ;;  %v385_v57 = vpack.c.bf16 %v183_v50, %v182_v49  ;;  %v85_v59 = vld [vmem:[#allocation5 + $0xc0] sm:$0xff]  ;;  %v387_v60 = vpack.c.bf16 %v201_v54, %v200_v53  ;;  %v101_v38 = vsub.s32 1, %v96_v35 }
  0x45   :  { %v184_v61 = vld [vmem:[#allocation7 + $0x30] sm:$0xff]  ;;  %v185_v62 = vld [vmem:[#allocation7 + $0x38] sm:$0xff]  ;;  %v367_v63 = vpack.c.bf16 %v88_v56, %v86_v55  ;;  %v202_v1 = vld [vmem:[#allocation7 + $0xc0] sm:$0xff] }
  0x46   :  { %382 = vmatpush3.bf16.msra.mxu1 %v381_v45  ;;  %v87_v0 = vld [vmem:[#allocation5 + $0xd0] sm:$0xff]  ;;  %v203_v2 = vld [vmem:[#allocation7 + $0xc8] sm:$0xff]  ;;  %v92_v4 = vld [vmem:[#allocation5 + $0xf8] sm:$0xff]  ;;  %v389_v5 = vpack.c.bf16 %v185_v62, %v184_v61 }
  0x47   :  { %358 = vmatpush1.bf16.msra.mxu0 %v357_v31  ;;  %384 = vmatprep.subr.bf16.mxu1 %v383_v48  ;;  %v90_v3 = vld [vmem:[#allocation5 + $0xe8] sm:$0xff]  ;;  %v369_v6 = vpack.c.bf16 %v87_v0, %v85_v59  ;;  %v89_v7 = vld [vmem:[#allocation5 + $0xe0] sm:$0xff]  ;;  %v391_v8 = vpack.c.bf16 %v203_v2, %v202_v1  ;;  %v91_v12 = vld [vmem:[#allocation5 + $0xf0] sm:$0xff] }
  0x48   :  { %360 = vmatprep.subr.bf16.mxu0 %v359_v36  ;;  %v186_v9 = vld [vmem:[#allocation7 + $0x40] sm:$0xff]  ;;  %v187_v10 = vld [vmem:[#allocation7 + $0x48] sm:$0xff]  ;;  %v371_v11 = vpack.c.bf16 %v92_v4, %v90_v3  ;;  %v204_v13 = vld [vmem:[#allocation7 + $0xd0] sm:$0xff]  ;;  %v373_v16 = vpack.c.bf16 %v91_v12, %v89_v7  ;;  %v97_v36 = vsub.s32 0, %v96_v35 }
  0x49   :  { %v205_v14 = vld [vmem:[#allocation7 + $0xd8] sm:$0xff]  ;;  %v393_v15 = vpack.c.bf16 %v187_v10, %v186_v9  ;;  %v188_v18 = vld [vmem:[#allocation7 + $0x50] sm:$0xff]  ;;  %v206_v20 = vld [vmem:[#allocation7 + $0xe0] sm:$0xff] }
  0x4a   :  { %386 = vmatpush3.bf16.msra.mxu1 %v385_v57  ;;  %v395_v17 = vpack.c.bf16 %v205_v14, %v204_v13  ;;  %v189_v19 = vld [vmem:[#allocation7 + $0x58] sm:$0xff]  ;;  %v207_v21 = vld [vmem:[#allocation7 + $0xe8] sm:$0xff]  ;;  %v190_v25 = vld [vmem:[#allocation7 + $0x60] sm:$0xff] }
  0x4b   :  { %362 = vmatpush1.bf16.msra.mxu0 %v361_v46  ;;  %388 = vmatprep.subr.bf16.mxu1 %v387_v60  ;;  %v397_v22 = vpack.c.bf16 %v189_v19, %v188_v18  ;;  %v60_v23 = vld [vmem:[#allocation2] sm:$0xff]  ;;  %v399_v24 = vpack.c.bf16 %v207_v21, %v206_v20  ;;  %v191_v26 = vld [vmem:[#allocation7 + $0x68] sm:$0xff]  ;;  %v208_v28 = vld [vmem:[#allocation7 + $0xf0] sm:$0xff] }
  0x4c   :  { %364 = vmatprep.subr.bf16.mxu0 %v363_v51  ;;  %v401_v27 = vpack.c.bf16 %v191_v26, %v190_v25  ;;  %v209_v29 = vld [vmem:[#allocation7 + $0xf8] sm:$0xff]  ;;  %v192_v31 = vld [vmem:[#allocation7 + $0x70] sm:$0xff] }
  0x4d   :  { %v403_v30 = vpack.c.bf16 %v209_v29, %v208_v28  ;;  %v193_v32 = vld [vmem:[#allocation7 + $0x78] sm:$0xff] }
  0x4e   :  { %390 = vmatpush3.bf16.msra.mxu1 %v389_v5  ;;  %v405_v33 = vpack.c.bf16 %v193_v32, %v192_v31  ;;  %v93_v37 = vld [vmem:[%s605_s2] sm:$0x3]  ;;  %s296_s2 = sshll.u32 %s518_s9, 4  ;;  %s297_s2 = int_to_ptr.vmem [resolvable:$true] %s296_s2 }
  0x4f   :  { %366 = vmatpush1.bf16.msra.mxu0 %v365_v58  ;;  %392 = vmatprep.subr.bf16.mxu1 %v391_v8  ;;  %v98_v39 = vrot.slane %v93_v37, %v97_v36  ;;  %v102_v40 = vrot.slane %v93_v37, %v101_v38  ;;  %v306_v48 = vld [vmem:[%s607_s4] ss:$0 sm:$0xff]  ;;  %s482_s10 = scalar_lea.vmem %s297_s2, 128  ;;  %p487_p11 = scmp.lt.s32.totalorder %s297_s2, %s297_s2 }
  0x50   :  { %368 = vmatprep.subr.bf16.mxu0 %v367_v63  ;;  %p483_p10 = scmp.ne.s32.totalorder %s297_s2, %s482_s10  ;;  %p488_p12 = scmp.lt.s32.totalorder %s482_s10, %s482_s10 }
  0x52   :  { %394 = vmatpush3.bf16.msra.mxu1 %v393_v15  ;;  %p489_p13 = por %p488_p12, %p487_p11 }
  0x53   :  { %370 = vmatpush1.bf16.msra.mxu0 %v369_v6  ;;  %396 = vmatprep.subr.bf16.mxu1 %v395_v17 }
  0x54   :  { %372 = vmatprep.subr.bf16.mxu0 %v371_v11  ;;  %p490_p0 = pnand %p489_p13, %p483_p10 }
  0x56   :  { %398 = vmatpush3.bf16.msra.mxu1 %v397_v22 }
  0x57   :  { %374 = vmatpush1.bf16.msra.mxu0 %v373_v16  ;;  %400 = vmatprep.subr.bf16.mxu1 %v399_v24 }
  0x5a   :  { %170 = vmatmul.mubr.f32.vlgmr.msra.gmra.mrb[0].mxu0 %v60_v23  ;;  %402 = vmatpush3.bf16.msra.mxu1 %v401_v27 }
  0x5b   :  { %404 = vmatprep.subr.bf16.mxu1 %v403_v30 }
  0x5e   :  { %406 = vmatpush3.bf16.msra.mxu1 %v405_v33 }
 0x12d   :  { %v171_v41 = vpop.f32.mrb[0].mxu0 }
 0x12e   :  { %v172_v42 = vadd.f32 %v171_v41, %v98_v39  ;;  %v173_v43 = vpop.f32.mrb[1].mxu0 }
 0x12f   :  { %v174_v44 = vadd.f32 %v173_v43, %v102_v40 }
 0x130   :  { %v176_v46 = vmax.f32 %v172_v42, 0.0 }
 0x131   :  { %v177_v45 = vmax.f32 %v174_v44, 0.0 }
 0x133   :  { %281 = vmatprep.mubr.f32.mxu1 %v177_v45 }
 0x134   :  { %282 = vmatmul.mubr.f32.vlgmr.msra.gmra.mrb[0].mxu1 %v176_v46 }
 0x207   :  { %v340_v47 = vpop.f32.mrb[0].mxu1 }
 0x208   :  { %v341_v49 = vpop.f32.mrb[1].mxu1 }
 0x209   :  { %v342_v50 = vadd.f32 %v341_v49, %v340_v47 }
 0x20b   :  { %v284_v51 = vadd.f32 %v342_v50, %v306_v48 }
 0x20d   :  { %v307_v52 = vclamps-f32 %v284_v51, 0.5 }
 0x20f   :  { %289 = vst [vmem:[#allocation8] sm:$0xff] %v307_v52 }
 0x210   :  { %493 = shalt.err (!%p490_p0)
}
 0x211   :  { %s494_s13 = scalar_lea.hbm %s608_s5, 128 }
 0x212   :  { %p495_p1 = scmp.ne.s32.totalorder %s608_s5, %s494_s13  ;;  %p498_p2 = scmp.lt.u32.totalorder %s494_s13, %s608_s5 }
 0x214   :  { %p500_p3 = pnand %p498_p2, %p495_p1 }
 0x216   :  { %503 = shalt.err (!%p500_p3)
}
 0x217   :  { %299 = dma.vmem_to_hbm [thread:$0]  %s297_s2, 128, %s608_s5, [#allocation4]  }
 0x218   :  { %508 = dma.done.wait [#allocation4], 128  }
 0x219   :  { %509 = vsyncadd [#allocation4], 4294967168 }
 0x21a   :  { %303 = vsyncpa [#allocation3], 1 }
 0x21b   :  { %304 = vsyncpa [#allocation6], 1 }
 0x21c   :  { %305 = vsyncpa [#allocation4], 1 }

// kernel: tpu_custom_call.1
= control target key start
LH: loop header
LB: loop body
LE: loop exit
PB: predicated region body
PF: predicated region fallthrough
CT: control target
= control target key end

     0   :  { %10 = vsyncpa [#allocation3], 0  ;;  %s603_s0 = inlined_call_operand.hbm [shape: f32[8,128], index: 0, kind: input, shape index: {}]   ;;  %s604_s1 = inlined_call_operand.hbm [shape: f32[128,256], index: 1, kind: input, shape index: {}]   ;;  %s605_s2 = inlined_call_operand.vmem [shape: f32[1,256], index: 2, kind: input, shape index: {}]   ;;  %s606_s3 = inlined_call_operand.hbm [shape: f32[256,128], index: 3, kind: input, shape index: {}]   ;;  %s607_s4 = inlined_call_operand.vmem [shape: f32[1,128], index: 4, kind: input, shape index: {}]   ;;  %s608_s5 = inlined_call_operand.hbm [shape: f32[8,128], index: 5, kind: output, shape index: {}]  }
   0x1   :  { %11 = vsyncpa [#allocation6], 0 }
   0x2   :  { %12 = vsyncpa [#allocation4], 0  ;;  %s510_s18 = smov [#allocation5]   ;;  %s416_s22 = scalar_lea.hbm %s604_s1, 4096 }
   0x3   :  { %s28_s19 = sshll.u32 %s510_s18, 4  ;;  %p417_p0 = scmp.ne.s32.totalorder %s604_s1, %s416_s22  ;;  %s29_s19 = int_to_ptr.vmem [resolvable:$true] %s28_s19 }
   0x4   :  { %p420_p1 = scmp.lt.u32.totalorder %s416_s22, %s604_s1 }
   0x6   :  { %p422_p2 = pnand %p420_p1, %p417_p0 }
   0x8   :  { %425 = shalt.err (!%p422_p2)
}
   0x9   :  { %s426_s27 = scalar_lea.vmem %s29_s19, 4096  ;;  %p431_p4 = scmp.lt.s32.totalorder %s29_s19, %s29_s19 }
   0xa   :  { %p427_p3 = scmp.ne.s32.totalorder %s29_s19, %s426_s27  ;;  %p432_p5 = scmp.lt.s32.totalorder %s426_s27, %s426_s27 }
   0xc   :  { %p433_p6 = por %p432_p5, %p431_p4 }
   0xe   :  { %p434_p7 = pnand %p433_p6, %p427_p3 }
  0x10   :  { %437 = shalt.err (!%p434_p7)
}
  0x11   :  { %s511_s28 = smov 256   ;;  %s512_s29 = smov 16  }
  0x12   :  { %34 = dma.hbm_to_vmem [thread:$0]  %s604_s1, 4096, %s29_s19, [#allocation6], %s511_s28, %s511_s28, %s512_s29  }
  0x13   :  { %s513_s7 = smov [#allocation2]   ;;  %s514_s9 = smov [#allocation7]  }
  0x14   :  { %s19_s8 = sshll.u32 %s513_s7, 4  ;;  %s42_s10 = sshll.u32 %s514_s9, 4  ;;  %s20_s8 = int_to_ptr.vmem [resolvable:$true] %s19_s8  ;;  %s43_s10 = int_to_ptr.vmem [resolvable:$true] %s42_s10 }
  0x15   :  { %s438_s13 = scalar_lea.hbm %s603_s0, 128 }
  0x16   :  { %p439_p8 = scmp.ne.s32.totalorder %s603_s0, %s438_s13  ;;  %p442_p9 = scmp.lt.u32.totalorder %s438_s13, %s603_s0 }
  0x18   :  { %p444_p10 = pnand %p442_p9, %p439_p8 }
  0x1a   :  { %447 = shalt.err (!%p444_p10)
}
  0x1b   :  { %s448_s1 = scalar_lea.vmem %s20_s8, 128  ;;  %p453_p12 = scmp.lt.s32.totalorder %s20_s8, %s20_s8 }
  0x1c   :  { %p449_p11 = scmp.ne.s32.totalorder %s20_s8, %s448_s1  ;;  %p454_p13 = scmp.lt.s32.totalorder %s448_s1, %s448_s1 }
  0x1e   :  { %p455_p0 = por %p454_p13, %p453_p12 }
  0x20   :  { %p456_p1 = pnand %p455_p0, %p449_p11 }
  0x22   :  { %459 = shalt.err (!%p456_p1)
}
  0x23   :  { %22 = dma.hbm_to_vmem [thread:$0]  %s603_s0, 128, %s20_s8, [#allocation3]  }
  0x24   :  { %s460_s22 = scalar_lea.hbm %s606_s3, 4096 }
  0x25   :  { %p461_p2 = scmp.ne.s32.totalorder %s606_s3, %s460_s22  ;;  %p464_p3 = scmp.lt.u32.totalorder %s460_s22, %s606_s3 }
  0x27   :  { %p466_p4 = pnand %p464_p3, %p461_p2 }
  0x29   :  { %469 = shalt.err (!%p466_p4)
}
  0x2a   :  { %s470_s27 = scalar_lea.vmem %s43_s10, 4096  ;;  %p475_p6 = scmp.lt.s32.totalorder %s43_s10, %s43_s10 }
  0x2b   :  { %p471_p5 = scmp.ne.s32.totalorder %s43_s10, %s470_s27  ;;  %p476_p7 = scmp.lt.s32.totalorder %s470_s27, %s470_s27 }
  0x2d   :  { %p477_p8 = por %p476_p7, %p475_p6 }
  0x2f   :  { %p478_p9 = pnand %p477_p8, %p471_p5 }
  0x31   :  { %481 = shalt.err (!%p478_p9)
}
  0x32   :  { %s515_s0 = smov 128   ;;  %s516_s28 = smov 8  }
  0x33   :  { %48 = dma.hbm_to_vmem [thread:$0]  %s606_s3, 4096, %s43_s10, [#allocation6], %s515_s0, %s515_s0, %s516_s28  }
  0x34   :  { %504 = dma.done.wait [#allocation3], 128  }
  0x35   :  { %505 = vsyncadd [#allocation3], 4294967168 }
  0x36   :  { %506 = dma.done.wait [#allocation6], 8192  }
  0x37   :  { %507 = vsyncadd [#allocation6], 4294959104  ;;  %v517_v0 = vmov 0.0   ;;  %v62_v1 = vld [vmem:[#allocation5 + $0x8] sm:$0xff]  ;;  %v64_v2 = vld [vmem:[#allocation5 + $0x18] sm:$0xff]  ;;  %s518_s9 = smov [#allocation8]  }
  0x38   :  { %169 = vmatprep.mubr.f32.mxu0 %v517_v0  ;;  %v61_v3 = vld [vmem:[#allocation5] sm:$0xff]  ;;  %v343_v4 = vpack.c.bf16 %v64_v2, %v62_v1  ;;  %v63_v5 = vld [vmem:[#allocation5 + $0x10] sm:$0xff]  ;;  %v66_v6 = vld [vmem:[#allocation5 + $0x28] sm:$0xff] }
  0x39   :  { %v68_v7 = vld [vmem:[#allocation5 + $0x38] sm:$0xff]  ;;  %v345_v8 = vpack.c.bf16 %v63_v5, %v61_v3  ;;  %v65_v10 = vld [vmem:[#allocation5 + $0x20] sm:$0xff]  ;;  %v67_v11 = vld [vmem:[#allocation5 + $0x30] sm:$0xff] }
  0x3a   :  { %v347_v9 = vpack.c.bf16 %v68_v7, %v66_v6  ;;  %v70_v12 = vld [vmem:[#allocation5 + $0x48] sm:$0xff]  ;;  %344 = vmatprep.subr.bf16.mxu0 %v343_v4  ;;  %v72_v13 = vld [vmem:[#allocation5 + $0x58] sm:$0xff]  ;;  %v349_v14 = vpack.c.bf16 %v67_v11, %v65_v10  ;;  %v69_v16 = vld [vmem:[#allocation5 + $0x40] sm:$0xff] }
  0x3b   :  { %346 = vmatpush1.bf16.msra.mxu0 %v345_v8  ;;  %v351_v15 = vpack.c.bf16 %v72_v13, %v70_v12  ;;  %v71_v17 = vld [vmem:[#allocation5 + $0x50] sm:$0xff]  ;;  %v74_v18 = vld [vmem:[#allocation5 + $0x68] sm:$0xff]  ;;  %v76_v19 = vld [vmem:[#allocation5 + $0x78] sm:$0xff] }
  0x3c   :  { %348 = vmatprep.subr.bf16.mxu0 %v347_v9  ;;  %v353_v20 = vpack.c.bf16 %v71_v17, %v69_v16  ;;  %v355_v21 = vpack.c.bf16 %v76_v19, %v74_v18  ;;  %v73_v22 = vld [vmem:[#allocation5 + $0x60] sm:$0xff]  ;;  %v75_v23 = vld [vmem:[#allocation5 + $0x70] sm:$0xff]  ;;  %v78_v24 = vld [vmem:[#allocation5 + $0x88] sm:$0xff] }
  0x3d   :  { %v80_v25 = vld [vmem:[#allocation5 + $0x98] sm:$0xff]  ;;  %v77_v26 = vld [vmem:[#allocation5 + $0x80] sm:$0xff]  ;;  %v79_v27 = vld [vmem:[#allocation5 + $0x90] sm:$0xff]  ;;  %v357_v31 = vpack.c.bf16 %v75_v23, %v73_v22 }
  0x3e   :  { %v194_v28 = vld [vmem:[#allocation7 + $0x80] sm:$0xff]  ;;  %v195_v29 = vld [vmem:[#allocation7 + $0x88] sm:$0xff]  ;;  %v196_v34 = vld [vmem:[#allocation7 + $0x90] sm:$0xff]  ;;  %v359_v36 = vpack.c.bf16 %v80_v25, %v78_v24  ;;  %v361_v46 = vpack.c.bf16 %v79_v27, %v77_v26 }
  0x3f   :  { %350 = vmatpush1.bf16.msra.mxu0 %v349_v14  ;;  %v178_v30 = vld [vmem:[#allocation7] sm:$0xff]  ;;  %v375_v32 = vpack.c.bf16 %v195_v29, %v194_v28  ;;  %v179_v33 = vld [vmem:[#allocation7 + $0x8] sm:$0xff]  ;;  %v197_v35 = vld [vmem:[#allocation7 + $0x98] sm:$0xff] }
  0x40   :  { %352 = vmatprep.subr.bf16.mxu0 %v351_v15  ;;  %v377_v37 = vpack.c.bf16 %v179_v33, %v178_v30  ;;  %v379_v38 = vpack.c.bf16 %v197_v35, %v196_v34  ;;  %v180_v39 = vld [vmem:[#allocation7 + $0x10] sm:$0xff]  ;;  %v181_v40 = vld [vmem:[#allocation7 + $0x18] sm:$0xff]  ;;  %v198_v41 = vld [vmem:[#allocation7 + $0xa0] sm:$0xff]  ;;  %v95_v34 = vlaneseq }
  0x41   :  { %v82_v42 = vld [vmem:[#allocation5 + $0xa8] sm:$0xff]  ;;  %v84_v43 = vld [vmem:[#allocation5 + $0xb8] sm:$0xff]  ;;  %376 = vmatprep.subr.bf16.mxu1 %v375_v32  ;;  %v381_v45 = vpack.c.bf16 %v181_v40, %v180_v39  ;;  %v81_v47 = vld [vmem:[#allocation5 + $0xa0] sm:$0xff] }
  0x42   :  { %v199_v44 = vld [vmem:[#allocation7 + $0xa8] sm:$0xff]  ;;  %378 = vmatpush3.bf16.msra.mxu1 %v377_v37  ;;  %v182_v49 = vld [vmem:[#allocation7 + $0x20] sm:$0xff]  ;;  %v363_v51 = vpack.c.bf16 %v84_v43, %v82_v42  ;;  %v83_v52 = vld [vmem:[#allocation5 + $0xb0] sm:$0xff]  ;;  %v96_v35 = vshrl.u32 %v95_v34, 7 }
  0x43   :  { %354 = vmatpush1.bf16.msra.mxu0 %v353_v20  ;;  %380 = vmatprep.subr.bf16.mxu1 %v379_v38  ;;  %v383_v48 = vpack.c.bf16 %v199_v44, %v198_v41  ;;  %v183_v50 = vld [vmem:[#allocation7 + $0x28] sm:$0xff]  ;;  %v200_v53 = vld [vmem:[#allocation7 + $0xb0] sm:$0xff]  ;;  %v201_v54 = vld [vmem:[#allocation7 + $0xb8] sm:$0xff]  ;;  %v365_v58 = vpack.c.bf16 %v83_v52, %v81_v47 }
  0x44   :  { %356 = vmatprep.subr.bf16.mxu0 %v355_v21  ;;  %v86_v55 = vld [vmem:[#allocation5 + $0xc8] sm:$0xff]  ;;  %v88_v56 = vld [vmem:[#allocation5 + $0xd8] sm:$0xff]  ;;  %v385_v57 = vpack.c.bf16 %v183_v50, %v182_v49  ;;  %v85_v59 = vld [vmem:[#allocation5 + $0xc0] sm:$0xff]  ;;  %v387_v60 = vpack.c.bf16 %v201_v54, %v200_v53  ;;  %v101_v38 = vsub.s32 1, %v96_v35 }
  0x45   :  { %v184_v61 = vld [vmem:[#allocation7 + $0x30] sm:$0xff]  ;;  %v185_v62 = vld [vmem:[#allocation7 + $0x38] sm:$0xff]  ;;  %v367_v63 = vpack.c.bf16 %v88_v56, %v86_v55  ;;  %v202_v1 = vld [vmem:[#allocation7 + $0xc0] sm:$0xff] }
  0x46   :  { %382 = vmatpush3.bf16.msra.mxu1 %v381_v45  ;;  %v87_v0 = vld [vmem:[#allocation5 + $0xd0] sm:$0xff]  ;;  %v203_v2 = vld [vmem:[#allocation7 + $0xc8] sm:$0xff]  ;;  %v92_v4 = vld [vmem:[#allocation5 + $0xf8] sm:$0xff]  ;;  %v389_v5 = vpack.c.bf16 %v185_v62, %v184_v61 }
  0x47   :  { %358 = vmatpush1.bf16.msra.mxu0 %v357_v31  ;;  %384 = vmatprep.subr.bf16.mxu1 %v383_v48  ;;  %v90_v3 = vld [vmem:[#allocation5 + $0xe8] sm:$0xff]  ;;  %v369_v6 = vpack.c.bf16 %v87_v0, %v85_v59  ;;  %v89_v7 = vld [vmem:[#allocation5 + $0xe0] sm:$0xff]  ;;  %v391_v8 = vpack.c.bf16 %v203_v2, %v202_v1  ;;  %v91_v12 = vld [vmem:[#allocation5 + $0xf0] sm:$0xff] }
  0x48   :  { %360 = vmatprep.subr.bf16.mxu0 %v359_v36  ;;  %v186_v9 = vld [vmem:[#allocation7 + $0x40] sm:$0xff]  ;;  %v187_v10 = vld [vmem:[#allocation7 + $0x48] sm:$0xff]  ;;  %v371_v11 = vpack.c.bf16 %v92_v4, %v90_v3  ;;  %v204_v13 = vld [vmem:[#allocation7 + $0xd0] sm:$0xff]  ;;  %v373_v16 = vpack.c.bf16 %v91_v12, %v89_v7  ;;  %v97_v36 = vsub.s32 0, %v96_v35 }
  0x49   :  { %v205_v14 = vld [vmem:[#allocation7 + $0xd8] sm:$0xff]  ;;  %v393_v15 = vpack.c.bf16 %v187_v10, %v186_v9  ;;  %v188_v18 = vld [vmem:[#allocation7 + $0x50] sm:$0xff]  ;;  %v206_v20 = vld [vmem:[#allocation7 + $0xe0] sm:$0xff] }
  0x4a   :  { %386 = vmatpush3.bf16.msra.mxu1 %v385_v57  ;;  %v395_v17 = vpack.c.bf16 %v205_v14, %v204_v13  ;;  %v189_v19 = vld [vmem:[#allocation7 + $0x58] sm:$0xff]  ;;  %v207_v21 = vld [vmem:[#allocation7 + $0xe8] sm:$0xff]  ;;  %v190_v25 = vld [vmem:[#allocation7 + $0x60] sm:$0xff] }
  0x4b   :  { %362 = vmatpush1.bf16.msra.mxu0 %v361_v46  ;;  %388 = vmatprep.subr.bf16.mxu1 %v387_v60  ;;  %v397_v22 = vpack.c.bf16 %v189_v19, %v188_v18  ;;  %v60_v23 = vld [vmem:[#allocation2] sm:$0xff]  ;;  %v399_v24 = vpack.c.bf16 %v207_v21, %v206_v20  ;;  %v191_v26 = vld [vmem:[#allocation7 + $0x68] sm:$0xff]  ;;  %v208_v28 = vld [vmem:[#allocation7 + $0xf0] sm:$0xff] }
  0x4c   :  { %364 = vmatprep.subr.bf16.mxu0 %v363_v51  ;;  %v401_v27 = vpack.c.bf16 %v191_v26, %v190_v25  ;;  %v209_v29 = vld [vmem:[#allocation7 + $0xf8] sm:$0xff]  ;;  %v192_v31 = vld [vmem:[#allocation7 + $0x70] sm:$0xff] }
  0x4d   :  { %v403_v30 = vpack.c.bf16 %v209_v29, %v208_v28  ;;  %v193_v32 = vld [vmem:[#allocation7 + $0x78] sm:$0xff] }
  0x4e   :  { %390 = vmatpush3.bf16.msra.mxu1 %v389_v5  ;;  %v405_v33 = vpack.c.bf16 %v193_v32, %v192_v31  ;;  %v93_v37 = vld [vmem:[%s605_s2] sm:$0x3]  ;;  %s296_s2 = sshll.u32 %s518_s9, 4  ;;  %s297_s2 = int_to_ptr.vmem [resolvable:$true] %s296_s2 }
  0x4f   :  { %366 = vmatpush1.bf16.msra.mxu0 %v365_v58  ;;  %392 = vmatprep.subr.bf16.mxu1 %v391_v8  ;;  %v98_v39 = vrot.slane %v93_v37, %v97_v36  ;;  %v102_v40 = vrot.slane %v93_v37, %v101_v38  ;;  %v306_v48 = vld [vmem:[%s607_s4] ss:$0 sm:$0xff]  ;;  %s482_s10 = scalar_lea.vmem %s297_s2, 128  ;;  %p487_p11 = scmp.lt.s32.totalorder %s297_s2, %s297_s2 }
  0x50   :  { %368 = vmatprep.subr.bf16.mxu0 %v367_v63  ;;  %p483_p10 = scmp.ne.s32.totalorder %s297_s2, %s482_s10  ;;  %p488_p12 = scmp.lt.s32.totalorder %s482_s10, %s482_s10 }
  0x52   :  { %394 = vmatpush3.bf16.msra.mxu1 %v393_v15  ;;  %p489_p13 = por %p488_p12, %p487_p11 }
  0x53   :  { %370 = vmatpush1.bf16.msra.mxu0 %v369_v6  ;;  %396 = vmatprep.subr.bf16.mxu1 %v395_v17 }
  0x54   :  { %372 = vmatprep.subr.bf16.mxu0 %v371_v11  ;;  %p490_p0 = pnand %p489_p13, %p483_p10 }
  0x56   :  { %398 = vmatpush3.bf16.msra.mxu1 %v397_v22 }
  0x57   :  { %374 = vmatpush1.bf16.msra.mxu0 %v373_v16  ;;  %400 = vmatprep.subr.bf16.mxu1 %v399_v24 }
  0x5a   :  { %170 = vmatmul.mubr.f32.vlgmr.msra.gmra.mrb[0].mxu0 %v60_v23  ;;  %402 = vmatpush3.bf16.msra.mxu1 %v401_v27 }
  0x5b   :  { %404 = vmatprep.subr.bf16.mxu1 %v403_v30 }
  0x5e   :  { %406 = vmatpush3.bf16.msra.mxu1 %v405_v33 }
 0x12d   :  { %v171_v41 = vpop.f32.mrb[0].mxu0 }
 0x12e   :  { %v172_v42 = vadd.f32 %v171_v41, %v98_v39  ;;  %v173_v43 = vpop.f32.mrb[1].mxu0 }
 0x12f   :  { %v174_v44 = vadd.f32 %v173_v43, %v102_v40 }
 0x130   :  { %v176_v46 = vmax.f32 %v172_v42, 0.0 }
 0x131   :  { %v177_v45 = vmax.f32 %v174_v44, 0.0 }
 0x133   :  { %281 = vmatprep.mubr.f32.mxu1 %v177_v45 }
 0x134   :  { %282 = vmatmul.mubr.f32.vlgmr.msra.gmra.mrb[0].mxu1 %v176_v46 }
 0x207   :  { %v340_v47 = vpop.f32.mrb[0].mxu1 }
 0x208   :  { %v341_v49 = vpop.f32.mrb[1].mxu1 }
 0x209   :  { %v342_v50 = vadd.f32 %v341_v49, %v340_v47 }
 0x20b   :  { %v284_v51 = vadd.f32 %v342_v50, %v306_v48 }
 0x20d   :  { %v307_v52 = vclamps-f32 %v284_v51, 0.5 }
 0x20f   :  { %289 = vst [vmem:[#allocation8] sm:$0xff] %v307_v52 }
 0x210   :  { %493 = shalt.err (!%p490_p0)
}
 0x211   :  { %s494_s13 = scalar_lea.hbm %s608_s5, 128 }
 0x212   :  { %p495_p1 = scmp.ne.s32.totalorder %s608_s5, %s494_s13  ;;  %p498_p2 = scmp.lt.u32.totalorder %s494_s13, %s608_s5 }
 0x214   :  { %p500_p3 = pnand %p498_p2, %p495_p1 }
 0x216   :  { %503 = shalt.err (!%p500_p3)
}
 0x217   :  { %299 = dma.vmem_to_hbm [thread:$0]  %s297_s2, 128, %s608_s5, [#allocation4]  }
 0x218   :  { %508 = dma.done.wait [#allocation4], 128  }
 0x219   :  { %509 = vsyncadd [#allocation4], 4294967168 }
 0x21a   :  { %303 = vsyncpa [#allocation3], 1 }
 0x21b   :  { %304 = vsyncpa [#allocation6], 1 }
 0x21c   :  { %305 = vsyncpa [#allocation4], 1 }

</bundles_post_ra>
